<compile_context>
chip_gen: v5e
topology: v5e:2x2
jax: 0.10.0
libtpu: 0.0.40
codegen_flags: <defaults>
</compile_context>

<pallas_src>
import jax
import jax.numpy as jnp
from jax import lax
from jax.experimental import pallas as pl
from jax.experimental.pallas import tpu as pltpu

# ----------------------------- configuration -------------------------------
B = 2            # batch
N = 8            # sequence length (nodes / tokens)
DIM = 32         # model dim
HEADS = 4
DIM_HEAD = 16
INNER = HEADS * DIM_HEAD          # 64
BN = B * N                        # 16  rows in (batch, token) layout
BHN = B * HEADS * N               # 64  rows in stacked (head, batch, token) layout
SCALE = DIM_HEAD ** (-0.5)
LA = 0.33
LD = 0.33
LG = 0.33
BIG = 1e30       # large-but-finite mask fill (exp(-BIG) == 0 in f32, no infs)
AUX_ROWS = 3 * BHN + 16           # aux slab rows (all regions 8-row aligned)
# dist_kernel_fn = 'exp'  (fn: exp(-t), mask fill value: +large)


# ------------------------------- kernel ------------------------------------
def attention_kernel(x_ref, wqkv_ref, wout_ref, aux_ref, out_ref):
    f32 = jnp.float32

    # Fused QKV projection, emitted directly in the stacked (head, batch, token)
    # layout thanks to the block-wise operand layout:
    #   (BHN, HEADS*DIM) @ (HEADS*DIM, 3*DIM_HEAD) -> (64, 48).  One MXU push.
    qkv = jnp.dot(x_ref[...], wqkv_ref[...], preferred_element_type=f32)
    q = qkv[:, 0:DIM_HEAD] * SCALE            # (64, 16)  (scale folded into q)
    k = qkv[:, DIM_HEAD:2 * DIM_HEAD]         # (64, 16)
    v = qkv[:, 2 * DIM_HEAD:3 * DIM_HEAD]     # (64, 16)

    # Auxiliary slab (sublane-packed, built host-side, layout only):
    adj = aux_ref[0:BHN, :]                   # (64,64) block-diag adjacency (0 off-block)
    dist = aux_ref[BHN:2 * BHN, :]            # (64,64) block-diag distance (BIG off-block)
    mq = aux_ref[2 * BHN:3 * BHN, 0:1]        # (64, 1) query-token validity (stacked order)
    bq = aux_ref[2 * BHN:3 * BHN, 1:2]        # (64, 1) query (head,batch) block id
    mk = aux_ref[3 * BHN:3 * BHN + 1, :]      # (1, 64) key-token validity   (stacked order)
    bk = aux_ref[3 * BHN + 8:3 * BHN + 9, :]  # (1, 64) key (head,batch) block id

    # Block-diagonal structure + pair mask: pure broadcast compares / multiplies,
    # no transpose, no integer division.
    same_blk = bq == bk                                   # (64,64) bool
    keep = jnp.where(same_blk, mq * mk, 0.0)              # (64,64) f32 pair mask
    keep_b = keep > 0.5

    # Scores: one (64,16)@(16,64) MXU push (contract last dims, no transpose).
    scores = lax.dot_general(q, k, (((1,), (1,)), ((), ())),
                             preferred_element_type=f32)  # (64,64)
    # Two-level fill: masked in-block pairs -> -BIG, off-block -> -2*BIG, so a
    # fully padded query row reproduces the reference's uniform in-block softmax
    # (and off-block V rows never leak into the output).
    scores = jnp.where(keep_b, scores, -BIG)
    scores = jnp.where(same_blk, scores, -2.0 * BIG)

    # Numerically stable softmax over the 64-wide rows (exact divide; EUP idle).
    scores = scores - jnp.max(scores, axis=-1, keepdims=True)
    e = jnp.exp(scores)
    attn = e / jnp.sum(e, axis=-1, keepdims=True)

    # Fold the head-independent adjacency / distance term into the same 64x64
    # mixing matrix -> a single (64,64)@(64,16) push covers everything.
    total = LA * attn + keep * (LG * adj + LD * jnp.exp(-dist))
    av = jnp.dot(total, v, preferred_element_type=f32)    # (64, 16)

    # Relayout stacked (head, batch*token, d) -> (batch*token, head*d):
    # 4 sublane-aligned slices + one lane concat; the slab never leaves vregs.
    o_slab = jnp.concatenate(
        [av[h * BN:(h + 1) * BN, :] for h in range(HEADS)], axis=1)  # (16, 64)

    # Output projection + bias (bias packed as row INNER of the weight operand).
    # (DIM=32 < 128 lanes -> masked vst is unavoidable at this feature width.)
    out_ref[...] = (jnp.dot(o_slab, wout_ref[0:INNER, :],
                            preferred_element_type=f32)
                    + wout_ref[INNER:INNER + 1, :])


# ------------------------------- wrapper ------------------------------------
@jax.jit
def attention_forward(x, mask, adjacency_mat, distance_mat, wqkv, wout, bout):
    f32 = jnp.float32
    x_flat = x.reshape(BN, DIM).astype(f32)
    mask_f = mask.astype(f32).reshape(BN)                       # (16,) in (b, n) order
    mask_stacked = jnp.tile(mask_f, (HEADS,))                   # (64,) in (h, b, n) order
    blk_stacked = jnp.repeat(jnp.arange(HEADS * B, dtype=f32), N)   # block id = h*B + b

    # x laid out block-wise so the in-kernel QKV matmul directly emits the
    # stacked (head, batch, token) rows (placement only, no arithmetic).
    x_blk = jnp.zeros((BHN, HEADS * DIM), f32)
    for h in range(HEADS):
        x_blk = x_blk.at[h * BN:(h + 1) * BN, h * DIM:(h + 1) * DIM].set(x_flat)

    # Per-head [Wq_h | Wk_h | Wv_h] stacked along the contraction dim.
    # to_qkv columns follow torch's 'b n (h qkv d)' layout.
    w4 = wqkv.astype(f32).reshape(DIM, HEADS, 3, DIM_HEAD)
    wqkv_blk = jnp.transpose(w4, (1, 0, 2, 3)).reshape(HEADS * DIM, 3 * DIM_HEAD)

    # Output projection with the bias folded in as row INNER (sublane-padded).
    wout_b = jnp.zeros((INNER + 8, DIM), f32)
    wout_b = wout_b.at[0:INNER, :].set(wout.astype(f32))
    wout_b = wout_b.at[INNER, :].set(bout.astype(f32))

    # Auxiliary slab (sublane-packed, all regions 8-row aligned):
    #   rows [0, 64)    block-diagonal adjacency (0 off-block)
    #   rows [64, 128)  block-diagonal distance  (BIG off-block -> exp() == 0)
    #   rows [128, 192) col 0: query-token mask, col 1: query block id
    #   row  192        key-token mask
    #   row  200        key block id
    aux = jnp.zeros((AUX_ROWS, BHN), f32)
    aux = aux.at[BHN:2 * BHN, :].set(BIG)
    for h in range(HEADS):
        for b in range(B):
            r = (h * B + b) * N
            aux = aux.at[r:r + N, r:r + N].set(adjacency_mat[b].astype(f32))
            aux = aux.at[BHN + r:BHN + r + N, r:r + N].set(distance_mat[b].astype(f32))
    aux = aux.at[2 * BHN:3 * BHN, 0].set(mask_stacked)
    aux = aux.at[2 * BHN:3 * BHN, 1].set(blk_stacked)
    aux = aux.at[3 * BHN, :].set(mask_stacked)
    aux = aux.at[3 * BHN + 8, :].set(blk_stacked)

    vmem = pl.BlockSpec(memory_space=pltpu.MemorySpace.VMEM)
    out_flat = pl.pallas_call(
        attention_kernel,
        out_shape=jax.ShapeDtypeStruct((BN, DIM), f32),
        in_specs=[vmem, vmem, vmem, vmem],
        out_specs=vmem,
    )(x_blk, wqkv_blk, wout_b, aux)

    return out_flat.reshape(B, N, DIM)


# --------------------------- pure-JAX reference ------------------------------
def attention_reference(x, mask, adjacency_mat, distance_mat, wqkv, wout, bout):
    b, n, _ = x.shape
    qkv = x @ wqkv                                               # (b, n, 3*h*d)
    qkv = qkv.reshape(b, n, HEADS, 3, DIM_HEAD).transpose(0, 2, 1, 3, 4)  # b h n 3 d
    q, k, v = qkv[..., 0, :], qkv[..., 1, :], qkv[..., 2, :]
    dots = jnp.einsum('bhid,bhjd->bhij', q, k) * SCALE
    big = jnp.finfo(jnp.float32).max
    m2 = mask[:, None, :, None] & mask[:, None, None, :]         # (b, 1, n, n)
    dots = jnp.where(m2, dots, -big)
    adj_m = jnp.where(m2, adjacency_mat[:, None], 0.0)
    dist_m = jnp.where(m2, distance_mat[:, None], big)
    attn = jax.nn.softmax(dots, axis=-1) * LA + LG * adj_m + LD * jnp.exp(-dist_m)
    out = jnp.einsum('bhij,bhjd->bhid', attn, v)
    out = out.transpose(0, 2, 1, 3).reshape(b, n, INNER)
    return out @ wout + bout


# --------------------------------- main --------------------------------------
if __name__ == "__main__":
    key = jax.random.PRNGKey(0)
    kx, km, ka, kd, k1, k2, k3 = jax.random.split(key, 7)

    x = jax.random.normal(kx, (B, N, DIM), dtype=jnp.float32)

    # token mask: mostly valid, a couple of padded positions
    mask = jnp.ones((B, N), dtype=bool)
    mask = mask.at[0, N - 1].set(False).at[1, N - 2].set(False)

    # adjacency (0/1) and non-negative distances
    adjacency_mat = (jax.random.uniform(ka, (B, N, N)) > 0.5).astype(jnp.float32)
    distance_mat = jax.random.uniform(kd, (B, N, N), dtype=jnp.float32) * 3.0

    # parameters (nn.Linear: to_qkv (3*inner, dim) no bias, to_out (dim, inner) + bias),
    # stored pre-transposed for x @ W form; qkv column layout is '(h, qkv, d)'.
    wqkv = jax.random.normal(k1, (DIM, 3 * INNER), dtype=jnp.float32) * (DIM ** -0.5)
    wout = jax.random.normal(k2, (INNER, DIM), dtype=jnp.float32) * (INNER ** -0.5)
    bout = jax.random.normal(k3, (DIM,), dtype=jnp.float32) * 0.01

    out = attention_forward(x, mask, adjacency_mat, distance_mat, wqkv, wout, bout)
    out = jax.block_until_ready(out)

    ref = attention_reference(x, mask, adjacency_mat, distance_mat, wqkv, wout, bout)
    assert out.shape == (B, N, DIM)
    # exact softmax divide in-kernel -> tight tolerance
    assert jnp.allclose(out, ref, atol=1e-4, rtol=1e-4), "mismatch vs reference"

    print("KERNEL_OK")
</pallas_src>

<mosaic_0001>
module attributes {stable_mosaic.version = 11 : i64} {
  func.func @attention_kernel(%arg0: memref<64x128xf32, #tpu.memory_space<vmem>>, %arg1: memref<128x48xf32, #tpu.memory_space<vmem>>, %arg2: memref<72x32xf32, #tpu.memory_space<vmem>>, %arg3: memref<208x64xf32, #tpu.memory_space<vmem>>, %arg4: memref<16x32xf32, #tpu.memory_space<vmem>>) attributes {dimension_semantics = [], scalar_prefetch = 0 : i64, scratch_operands = 0 : i64, tpu.core_type = #tpu.core_type<tc>} {
    %c0 = arith.constant 0 : index
    %c0_0 = arith.constant 0 : index
    %0 = vector.load %arg0[%c0, %c0_0] : memref<64x128xf32, #tpu.memory_space<vmem>>, vector<64x128xf32>
    %c0_1 = arith.constant 0 : index
    %c0_2 = arith.constant 0 : index
    %1 = vector.load %arg1[%c0_1, %c0_2] : memref<128x48xf32, #tpu.memory_space<vmem>>, vector<128x48xf32>
    %cst = arith.constant dense<0.000000e+00> : vector<64x48xf32>
    %2 = tpu.matmul %0, %1, %cst {dimension_numbers = #tpu.dot_dimension_numbers<[1], [0], [0], [1], [0, 0, 1, 1], [], []>} : vector<64x128xf32>, vector<128x48xf32>, vector<64x48xf32> -> vector<64x48xf32>
    %3 = vector.extract_strided_slice %2 {offsets = [0, 0], sizes = [64, 16], strides = [1, 1]} : vector<64x48xf32> to vector<64x16xf32>
    %cst_3 = arith.constant 2.500000e-01 : f32
    %4 = vector.broadcast %cst_3 : f32 to vector<64x16xf32>
    %5 = arith.mulf %3, %4 : vector<64x16xf32>
    %6 = vector.extract_strided_slice %2 {offsets = [0, 16], sizes = [64, 16], strides = [1, 1]} : vector<64x48xf32> to vector<64x16xf32>
    %7 = vector.extract_strided_slice %2 {offsets = [0, 32], sizes = [64, 16], strides = [1, 1]} : vector<64x48xf32> to vector<64x16xf32>
    %c0_4 = arith.constant 0 : index
    %c0_5 = arith.constant 0 : index
    %8 = vector.load %arg3[%c0_4, %c0_5] : memref<208x64xf32, #tpu.memory_space<vmem>>, vector<64x64xf32>
    %c64 = arith.constant 64 : index
    %c0_6 = arith.constant 0 : index
    %9 = vector.load %arg3[%c64, %c0_6] : memref<208x64xf32, #tpu.memory_space<vmem>>, vector<64x64xf32>
    %c128 = arith.constant 128 : index
    %c0_7 = arith.constant 0 : index
    %10 = vector.load %arg3[%c128, %c0_7] : memref<208x64xf32, #tpu.memory_space<vmem>>, vector<64x1xf32>
    %c128_8 = arith.constant 128 : index
    %c1 = arith.constant 1 : index
    %11 = vector.load %arg3[%c128_8, %c1] : memref<208x64xf32, #tpu.memory_space<vmem>>, vector<64x1xf32>
    %c192 = arith.constant 192 : index
    %c0_9 = arith.constant 0 : index
    %12 = vector.load %arg3[%c192, %c0_9] : memref<208x64xf32, #tpu.memory_space<vmem>>, vector<1x64xf32>
    %c200 = arith.constant 200 : index
    %c0_10 = arith.constant 0 : index
    %13 = vector.load %arg3[%c200, %c0_10] : memref<208x64xf32, #tpu.memory_space<vmem>>, vector<1x64xf32>
    %14 = vector.broadcast %11 : vector<64x1xf32> to vector<64x64xf32>
    %15 = vector.broadcast %13 : vector<1x64xf32> to vector<64x64xf32>
    %16 = arith.cmpf oeq, %14, %15 : vector<64x64xf32>
    %17 = vector.broadcast %10 : vector<64x1xf32> to vector<64x64xf32>
    %18 = vector.broadcast %12 : vector<1x64xf32> to vector<64x64xf32>
    %19 = arith.mulf %17, %18 : vector<64x64xf32>
    %cst_11 = arith.constant 0.000000e+00 : f32
    %20 = vector.broadcast %cst_11 : f32 to vector<64x64xf32>
    %21 = arith.select %16, %19, %20 : vector<64x64xi1>, vector<64x64xf32>
    %cst_12 = arith.constant 5.000000e-01 : f32
    %22 = vector.broadcast %cst_12 : f32 to vector<64x64xf32>
    %23 = arith.cmpf ogt, %21, %22 : vector<64x64xf32>
    %cst_13 = arith.constant dense<0.000000e+00> : vector<64x64xf32>
    %24 = tpu.matmul %5, %6, %cst_13 {dimension_numbers = #tpu.dot_dimension_numbers<[1], [1], [0], [0], [0, 0, 1, 0], [], []>} : vector<64x16xf32>, vector<64x16xf32>, vector<64x64xf32> -> vector<64x64xf32>
    %cst_14 = arith.constant -1.000000e+30 : f32
    %25 = vector.broadcast %cst_14 : f32 to vector<64x64xf32>
    %26 = arith.select %23, %24, %25 : vector<64x64xi1>, vector<64x64xf32>
    %cst_15 = arith.constant -2.000000e+30 : f32
    %27 = vector.broadcast %cst_15 : f32 to vector<64x64xf32>
    %28 = arith.select %16, %26, %27 : vector<64x64xi1>, vector<64x64xf32>
    %cst_16 = arith.constant dense<0xFF800000> : vector<64xf32>
    %29 = vector.multi_reduction <maximumf>, %28, %cst_16 [1] : vector<64x64xf32> to vector<64xf32>
    %30 = vector.shape_cast %29 : vector<64xf32> to vector<64x1xf32>
    %31 = vector.broadcast %30 : vector<64x1xf32> to vector<64x64xf32>
    %32 = arith.subf %28, %31 : vector<64x64xf32>
    %33 = math.exp %32 : vector<64x64xf32>
    %cst_17 = arith.constant dense<0.000000e+00> : vector<64xf32>
    %34 = vector.multi_reduction <add>, %33, %cst_17 [1] : vector<64x64xf32> to vector<64xf32>
    %35 = vector.shape_cast %34 : vector<64xf32> to vector<64x1xf32>
    %36 = vector.broadcast %35 : vector<64x1xf32> to vector<64x64xf32>
    %37 = arith.divf %33, %36 : vector<64x64xf32>
    %cst_18 = arith.constant 3.300000e-01 : f32
    %38 = vector.broadcast %cst_18 : f32 to vector<64x64xf32>
    %39 = arith.mulf %38, %37 : vector<64x64xf32>
    %cst_19 = arith.constant 3.300000e-01 : f32
    %40 = vector.broadcast %cst_19 : f32 to vector<64x64xf32>
    %41 = arith.mulf %40, %8 : vector<64x64xf32>
    %cst_20 = arith.constant 0.000000e+00 : f32
    %42 = vector.broadcast %cst_20 : f32 to vector<64x64xf32>
    %43 = arith.subf %42, %9 : vector<64x64xf32>
    %44 = math.exp %43 : vector<64x64xf32>
    %cst_21 = arith.constant 3.300000e-01 : f32
    %45 = vector.broadcast %cst_21 : f32 to vector<64x64xf32>
    %46 = arith.mulf %45, %44 : vector<64x64xf32>
    %47 = arith.addf %41, %46 : vector<64x64xf32>
    %48 = arith.mulf %21, %47 : vector<64x64xf32>
    %49 = arith.addf %39, %48 : vector<64x64xf32>
    %cst_22 = arith.constant dense<0.000000e+00> : vector<64x16xf32>
    %50 = tpu.matmul %49, %7, %cst_22 {dimension_numbers = #tpu.dot_dimension_numbers<[1], [0], [0], [1], [0, 0, 1, 1], [], []>} : vector<64x64xf32>, vector<64x16xf32>, vector<64x16xf32> -> vector<64x16xf32>
    %51 = vector.extract_strided_slice %50 {offsets = [0, 0], sizes = [16, 16], strides = [1, 1]} : vector<64x16xf32> to vector<16x16xf32>
    %52 = vector.extract_strided_slice %50 {offsets = [16, 0], sizes = [16, 16], strides = [1, 1]} : vector<64x16xf32> to vector<16x16xf32>
    %53 = vector.extract_strided_slice %50 {offsets = [32, 0], sizes = [16, 16], strides = [1, 1]} : vector<64x16xf32> to vector<16x16xf32>
    %54 = vector.extract_strided_slice %50 {offsets = [48, 0], sizes = [16, 16], strides = [1, 1]} : vector<64x16xf32> to vector<16x16xf32>
    %55 = tpu.concatenate %51, %52, %53, %54 in 1 : vector<16x16xf32>, vector<16x16xf32>, vector<16x16xf32>, vector<16x16xf32> -> vector<16x64xf32>
    %c0_23 = arith.constant 0 : index
    %c0_24 = arith.constant 0 : index
    %56 = vector.load %arg2[%c0_23, %c0_24] : memref<72x32xf32, #tpu.memory_space<vmem>>, vector<64x32xf32>
    %cst_25 = arith.constant dense<0.000000e+00> : vector<16x32xf32>
    %57 = tpu.matmul %55, %56, %cst_25 {dimension_numbers = #tpu.dot_dimension_numbers<[1], [0], [0], [1], [0, 0, 1, 1], [], []>} : vector<16x64xf32>, vector<64x32xf32>, vector<16x32xf32> -> vector<16x32xf32>
    %c64_26 = arith.constant 64 : index
    %c0_27 = arith.constant 0 : index
    %58 = vector.load %arg2[%c64_26, %c0_27] : memref<72x32xf32, #tpu.memory_space<vmem>>, vector<1x32xf32>
    %59 = vector.broadcast %58 : vector<1x32xf32> to vector<16x32xf32>
    %60 = arith.addf %57, %59 : vector<16x32xf32>
    %c0_28 = arith.constant 0 : index
    %c0_29 = arith.constant 0 : index
    %61 = vector.load %arg4[%c0_28, %c0_29] : memref<16x32xf32, #tpu.memory_space<vmem>>, vector<16x32xf32>
    tpu.vector_store %arg4[%c0_28, %c0_29], %60 {strides = array<i32>} : memref<16x32xf32, #tpu.memory_space<vmem>>, vector<16x32xf32>,
    return
  }
}

</mosaic_0001>

<bundles_post_ra>
// kernel: tile.6
= control target key start
LH: loop header
LB: loop body
LE: loop exit
PB: predicated region body
PF: predicated region fallthrough
CT: control target
= control target key end

     0   :  { %s22_s0 = inlined_call_operand.vmem [shape: f32[16], index: 0, kind: input, shape index: {}]   ;;  %s23_s1 = inlined_call_operand.vmem [shape: f32[4,16], index: 1, kind: output, shape index: {}]  }
   0x1   :  { %v4_v0 = vld [vmem:[%s22_s0] ss:$0 sm:$0xff] }
   0x2   :  { %5 = vst [vmem:[%s23_s1] sm:$0xf] %v4_v0 }

// kernel: attention_forward.1
= control target key start
LH: loop header
LB: loop body
LE: loop exit
PB: predicated region body
PF: predicated region fallthrough
CT: control target
= control target key end

     0   :  { %s1453_s0 = inlined_call_operand.vmem [shape: f32[64,128], index: 0, kind: input, shape index: {}]   ;;  %s1454_s1 = inlined_call_operand.vmem [shape: f32[128,48], index: 1, kind: input, shape index: {}]   ;;  %s1455_s2 = inlined_call_operand.vmem [shape: f32[72,32], index: 2, kind: input, shape index: {}]   ;;  %s1456_s3 = inlined_call_operand.vmem [shape: f32[208,64], index: 3, kind: input, shape index: {}]   ;;  %s1457_s4 = inlined_call_operand.hbm [shape: f32[16,32], index: 4, kind: output, shape index: {}]  }
   0x1   :  { %v41_v0 = vld [vmem:[%s1454_s1 + $0x78] sm:$0xff]  ;;  %v40_v1 = vld [vmem:[%s1454_s1 + $0x70] sm:$0xff]  ;;  %v39_v2 = vld [vmem:[%s1454_s1 + $0x68] sm:$0xff] }
   0x2   :  { %42 = vmatpush.msra.mxu0 %v41_v0  ;;  %816 = vmatpush.msra.mxu3 %v41_v0  ;;  %v38_v3 = vld [vmem:[%s1454_s1 + $0x60] sm:$0xff]  ;;  %v37_v4 = vld [vmem:[%s1454_s1 + $0x58] sm:$0xff] }
   0x4   :  { %43 = vmatpush.msra.mxu0 %v40_v1  ;;  %817 = vmatpush.msra.mxu3 %v40_v1 }
   0x6   :  { %44 = vmatpush.msra.mxu0 %v39_v2  ;;  %818 = vmatpush.msra.mxu3 %v39_v2 }
   0x8   :  { %45 = vmatpush.msra.mxu0 %v38_v3  ;;  %819 = vmatpush.msra.mxu3 %v38_v3 }
   0x9   :  { %9 = vsyncpa [#allocation3], 0  ;;  %v36_v5 = vld [vmem:[%s1454_s1 + $0x50] sm:$0xff]  ;;  %v35_v6 = vld [vmem:[%s1454_s1 + $0x48] sm:$0xff]  ;;  %v951_v25 = vmov 1   ;;  %v952_v29 = vmov 0  }
   0xa   :  { %46 = vmatpush.msra.mxu0 %v37_v4  ;;  %820 = vmatpush.msra.mxu3 %v37_v4  ;;  %v34_v7 = vld [vmem:[%s1454_s1 + $0x40] sm:$0xff]  ;;  %v33_v8 = vld [vmem:[%s1454_s1 + $0x38] sm:$0xff]  ;;  %v32_v9 = vld [vmem:[%s1454_s1 + $0x30] sm:$0xff]  ;;  %s954_s16 = smov 96   ;;  %vm247_vm0 = vcmask 130048   ;;  %vm345_vm4 = vcmask 523264  }
   0xb   :  { %v31_v10 = vld [vmem:[%s1454_s1 + $0x28] sm:$0xff]  ;;  %v30_v11 = vld [vmem:[%s1454_s1 + $0x20] sm:$0xff]  ;;  %v29_v12 = vld [vmem:[%s1454_s1 + $0x18] sm:$0xff]  ;;  %843 = vset.pattern.permute.xlu0 %v951_v25  ;;  %844 = vset.pattern.permute.xlu1 %v952_v29  ;;  %s956_s8 = smov 32   ;;  %s957_s9 = smov 48  }
   0xc   :  { %47 = vmatpush.msra.mxu0 %v36_v5  ;;  %821 = vmatpush.msra.mxu3 %v36_v5  ;;  %v28_v13 = vld [vmem:[%s1454_s1 + $0x10] sm:$0xff]  ;;  %v27_v14 = vld [vmem:[%s1454_s1 + $0x8] sm:$0xff]  ;;  %v26_v15 = vld [vmem:[%s1454_s1] sm:$0xff]  ;;  %s958_s27 = smov [#allocation2]   ;;  %s778_s30 = sshll.u32 %s1457_s4, 4  ;;  %s779_s30 = int_to_ptr.hbm [resolvable:$true] %s778_s30 }
   0xd   :  { %v18_v16 = vld [vmem:[%s1453_s0] sm:$0xff]  ;;  %v24_v17 = vld [vmem:[%s1453_s0 + $0x30] sm:$0xff]  ;;  %v19_v18 = vld [vmem:[%s1453_s0 + $0x8] sm:$0xff]  ;;  %842 = vset.pattern.permute.xlu2 %v952_v29  ;;  %s776_s1 = sshll.u32 %s958_s27, 4  ;;  %s959_s5 = smov 128   ;;  %s777_s1 = int_to_ptr.vmem [resolvable:$true] %s776_s1 }
   0xe   :  { %48 = vmatpush.msra.mxu0 %v35_v6  ;;  %822 = vmatpush.msra.mxu3 %v35_v6  ;;  %v25_v19 = vld [vmem:[%s1453_s0 + $0x38] sm:$0xff]  ;;  %v20_v20 = vld [vmem:[%s1453_s0 + $0x10] sm:$0xff]  ;;  %v22_v22 = vld [vmem:[%s1453_s0 + $0x20] sm:$0xff]  ;;  %s960_s6 = smov 8  }
   0xf   :  { %v21_v21 = vld [vmem:[%s1453_s0 + $0x18] sm:$0xff]  ;;  %v23_v23 = vld [vmem:[%s1453_s0 + $0x28] sm:$0xff]  ;;  %s953_s0 = smov 112   ;;  %v107_v35 = vld [vmem:[%s1456_s3 + $0x80] sm:$0xff] }
  0x10   :  { %49 = vmatpush.msra.mxu0 %v34_v7  ;;  %823 = vmatpush.msra.mxu3 %v34_v7  ;;  %v110_v38 = vld [vmem:[%s1456_s3 + $0x98] sm:$0xff]  ;;  %v112_v39 = vld [vmem:[%s1456_s3 + $0xa8] sm:$0xff]  ;;  %v109_v47 = vld [vmem:[%s1456_s3 + $0x90] sm:$0xff] }
  0x11   :  { %v108_v44 = vld [vmem:[%s1456_s3 + $0x88] sm:$0xff]  ;;  %v111_v58 = vld [vmem:[%s1456_s3 + $0xa0] sm:$0xff]  ;;  %v113_v61 = vld [vmem:[%s1456_s3 + $0xb0] sm:$0xff] }
  0x12   :  { %50 = vmatpush.msra.mxu0 %v33_v8  ;;  %824 = vmatpush.msra.mxu3 %v33_v8  ;;  %v114_v0 = vld [vmem:[%s1456_s3 + $0xb8] sm:$0xff]  ;;  %v1160_v6 = vld [vmem:[%s1456_s3 + $0xc0] ss:$0 sm:$0xff]  ;;  %v1165_v8 = vld [vmem:[%s1456_s3 + $0xc8] ss:$0 sm:$0xff] }
  0x14   :  { %51 = vmatpush.msra.mxu0 %v32_v9  ;;  %825 = vmatpush.msra.mxu3 %v32_v9 }
  0x16   :  { %52 = vmatpush.msra.mxu0 %v31_v10  ;;  %826 = vmatpush.msra.mxu3 %v31_v10 }
  0x18   :  { %53 = vmatpush.msra.mxu0 %v30_v11  ;;  %827 = vmatpush.msra.mxu3 %v30_v11 }
  0x1a   :  { %54 = vmatpush.msra.mxu0 %v29_v12  ;;  %828 = vmatpush.msra.mxu3 %v29_v12 }
  0x1c   :  { %55 = vmatpush.msra.mxu0 %v28_v13  ;;  %829 = vmatpush.msra.mxu3 %v28_v13 }
  0x1e   :  { %56 = vmatpush.msra.mxu0 %v27_v14  ;;  %830 = vmatpush.msra.mxu3 %v27_v14 }
  0x20   :  { %57 = vmatpush.msra.mxu0 %v26_v15  ;;  %831 = vmatpush.msra.mxu3 %v26_v15 }
  0x21   :  { %58 = vmatmul.f32.vlgmr.msra.gmra.mxu0 %v18_v16  ;;  %76 = vmatmul.f32.vlgmr.msra.gmra.mxu3 %v24_v17 }
  0x29   :  { %61 = vmatmul.f32.gmra.mxu0 %v19_v18  ;;  %79 = vmatmul.f32.gmra.mxu3 %v25_v19 }
  0x31   :  { %64 = vmatmul.f32.gmra.mxu0 %v20_v20 }
  0x39   :  { %67 = vmatmul.f32.gmra.mxu0 %v21_v21 }
  0x41   :  { %70 = vmatmul.f32.gmra.mxu0 %v22_v22 }
  0x49   :  { %73 = vmatmul.f32.gmra.mxu0 %v23_v23 }
  0x9e   :  { %v1058_v24 = vpop.f32.mrf.mxu0 }
  0x9f   :  { %v83_v56 = vmul.f32 0.25, %v1058_v24 }
  0xa4   :  { %v1061_v26 = vpop.f32.mrf.mxu3 }
  0xa5   :  { %v89_v2 = vmul.f32 0.25, %v1061_v26 }
  0xa6   :  { %v1063_v27 = vpop.f32.mrf.mxu0 }
  0xa7   :  { %v868_v28 = vpack.i.bf16 %v1058_v24, %v1063_v27  ;;  %v84_v59 = vmul.f32 0.25, %v1063_v27 }
  0xac   :  { %v1069_v30 = vpop.f32.mrf.mxu3 }
  0xad   :  { %245 = vrot.lane.b32.xlu0 %v1069_v30, %s953_s0  ;;  %v853_v40 = vpack.i.bf16 %v1061_v26, %v1069_v30  ;;  %v90_v3 = vmul.f32 0.25, %v1069_v30 }
  0xae   :  { %v1072_v31 = vpop.f32.mrf.mxu0 }
  0xaf   :  { %v85_v60 = vmul.f32 0.25, %v1072_v31 }
  0xb5   :  { %243 = vrot.lane.b32.xlu0 %v1061_v26, %s953_s0 }
  0xb6   :  { %v1075_v32 = vpop.f32.mrf.mxu0 }
  0xb7   :  { %v863_v33 = vpack.i.bf16 %v1072_v31, %v1075_v32  ;;  %237 = vrot.lane.b32.xlu2 %v1075_v32, %s953_s0  ;;  %v86_v62 = vmul.f32 0.25, %v1075_v32 }
  0xbd   :  { %233 = vrot.lane.b32.xlu0 %v1063_v27, %s953_s0 }
  0xbe   :  { %v1081_v34 = vpop.f32.mrf.mxu0 }
  0xbf   :  { %235 = vrot.lane.b32.xlu2 %v1072_v31, %s953_s0  ;;  %v87_v63 = vmul.f32 0.25, %v1081_v34 }
  0xc5   :  { %119 = vperm.xlu0 %843, %v107_v35  }
  0xc6   :  { %v1087_v36 = vpop.f32.mrf.mxu0 }
  0xc7   :  { %v858_v37 = vpack.i.bf16 %v1081_v34, %v1087_v36  ;;  %241 = vrot.lane.b32.xlu1 %v1087_v36, %s953_s0  ;;  %167 = vperm.xlu2 %842, %v107_v35   ;;  %v88_v1 = vmul.f32 0.25, %v1087_v36 }
  0xcd   :  { %846 = vset.pattern.permute.xlu0 %v952_v29 }
  0xce   :  { %179 = vperm.xlu0 %846, %v110_v38  }
  0xcf   :  { %239 = vrot.lane.b32.xlu1 %v1081_v34, %s953_s0  ;;  %845 = vset.pattern.permute.xlu2 %v951_v25 }
  0xd0   :  { %124 = vperm.xlu2 %845, %v108_v44  }
  0xd6   :  { %849 = vset.pattern.permute.xlu0 %v951_v25 }
  0xd7   :  { %144 = vperm.xlu0 %849, %v112_v39   ;;  %231 = vrot.lane.b32.xlu1 %v1058_v24, %s953_s0 }
  0xd8   :  { %129 = vperm.xlu2 %845, %v109_v47  }
  0xdf   :  { %854 = vrot.lane.b32.xlu0 %v853_v40, %s954_s16  ;;  %171 = vperm.xlu1 %844, %v108_v44  }
  0xe0   :  { %873 = vset.pattern.permute.xlu0 %v952_v29  ;;  %848 = vset.pattern.permute.xlu2 %v952_v29 }
  0xe1   :  { %183 = vperm.xlu2 %848, %v111_v58  }
  0xe7   :  { %175 = vperm.xlu1 %844, %v109_v47  }
  0xe9   :  { %187 = vperm.xlu2 %848, %v112_v39  }
  0xef   :  { %847 = vset.pattern.permute.xlu1 %v951_v25 }
  0xf0   :  { %134 = vperm.xlu1 %847, %v110_v38  }
  0xf1   :  { %191 = vperm.xlu2 %848, %v113_v61  }
  0xf8   :  { %139 = vperm.xlu1 %847, %v111_v58  }
  0xf9   :  { %850 = vset.pattern.permute.xlu2 %v951_v25 }
  0xfa   :  { %149 = vperm.xlu2 %850, %v113_v61  }
 0x102   :  { %851 = vset.pattern.permute.xlu2 %v952_v29 }
 0x103   :  { %195 = vperm.xlu2 %851, %v114_v0  }
 0x10b   :  { %852 = vset.pattern.permute.xlu2 %v951_v25 }
 0x10c   :  { %154 = vperm.xlu2 %852, %v114_v0  }
 0x111   :  { %v238_v48 = vpop.permute.xlu2 %237 }
 0x119   :  { %v236_v51 = vpop.permute.xlu2 %235 }
 0x11f   :  { %v246_v41 = vpop.permute.xlu0 %245 }
 0x120   :  { %790 = vmatpush.xpose.msk.msra.mxu1 %vm247_vm0, %v246_v41 }
 0x121   :  { %v168_v4 = vpop.permute.xlu2 %167 }
 0x122   :  { %v199_v9 = vmul.f32 %v1160_v6, %v168_v4 }
 0x127   :  { %v244_v42 = vpop.permute.xlu0 %243 }
 0x128   :  { %791 = vmatpush.xpose.msk.msra.mxu1 %vm247_vm0, %v244_v42 }
 0x12a   :  { %v125_v5 = vpop.permute.xlu2 %124 }
 0x12b   :  { %vm159_vm3 = vcmp.eq.f32.partialorder %v125_v5, %v1165_v8 }
 0x12f   :  { %v234_v43 = vpop.permute.xlu0 %233 }
 0x132   :  { %v130_v7 = vpop.permute.xlu2 %129 }
 0x133   :  { %vm160_vm6 = vcmp.eq.f32.partialorder %v130_v7, %v1165_v8 }
 0x137   :  { %v1112_v45 = vpop.permute.xlu0 %119 }
 0x138   :  { %vm158_vm1 = vcmp.eq.f32.partialorder %v1112_v45, %v1165_v8 }
 0x139   :  { %v242_v46 = vpop.permute.xlu1 %241  ;;  %v1170_v11 = vsel %vm158_vm1, %v199_v9, 0.0 }
 0x13a   :  { %792 = vmatpush.xpose.msk.msra.mxu1 %vm247_vm0, %v242_v46  ;;  %vm215_vm2 = vcmp.gt.f32.partialorder %v1170_v11, 0.5 }
 0x13b   :  { %v184_v12 = vpop.permute.xlu2 %183 }
 0x13c   :  { %v203_v46 = vmul.f32 %v1160_v6, %v184_v12 }
 0x140   :  { %v1118_v49 = vpop.permute.xlu0 %179 }
 0x141   :  { %v240_v50 = vpop.permute.xlu1 %239  ;;  %v202_v35 = vmul.f32 %v1160_v6, %v1118_v49 }
 0x142   :  { %793 = vmatpush.xpose.msk.msra.mxu1 %vm247_vm0, %v240_v50 }
 0x143   :  { %v188_v20 = vpop.permute.xlu2 %187 }
 0x146   :  { %794 = vmatpush.xpose.msk.msra.mxu1 %vm247_vm0, %v238_v48 }
 0x149   :  { %v1124_v52 = vpop.permute.xlu0 %144  ;;  %v232_v53 = vpop.permute.xlu1 %231 }
 0x14a   :  { %795 = vmatpush.xpose.msk.msra.mxu1 %vm247_vm0, %v236_v51  ;;  %vm163_vm12 = vcmp.eq.f32.partialorder %v1124_v52, %v1165_v8 }
 0x14b   :  { %v192_v40 = vpop.permute.xlu2 %191 }
 0x14c   :  { %v205_v61 = vmul.f32 %v1160_v6, %v192_v40 }
 0x14e   :  { %796 = vmatpush.xpose.msk.msra.mxu1 %vm247_vm0, %v234_v43 }
 0x151   :  { %v855_v54 = vpop.permute.xlu0 %854  ;;  %v172_v10 = vpop.permute.xlu1 %171 }
 0x152   :  { %797 = vmatpush.xpose.msk.msra.mxu1 %vm247_vm0, %v232_v53  ;;  %v856_v55 = vunpack.i.l.bf16 %v855_v54  ;;  %v857_v57 = vunpack.i.h.bf16 %v855_v54  ;;  %v200_v13 = vmul.f32 %v1160_v6, %v172_v10  ;;  %v204_v54 = vmul.f32 %v1160_v6, %v188_v20 }
 0x154   :  { %666 = vmatpush.msra.mxu2 %v856_v55  ;;  %v1179_v18 = vsel %vm159_vm3, %v200_v13, 0.0  ;;  %v150_v49 = vpop.permute.xlu2 %149 }
 0x155   :  { %798 = vmatmul.msk.f32.vlgmr.msra.gmra.mxu1 %vm247_vm0, %v83_v56  ;;  %vm216_vm5 = vcmp.gt.f32.partialorder %v1179_v18, 0.5  ;;  %vm164_vm14 = vcmp.eq.f32.partialorder %v150_v49, %v1165_v8 }
 0x156   :  { %667 = vmatpush.msra.mxu2 %v857_v57  ;;  %v1223_v0 = vsel %vm164_vm14, %v205_v61, 0.0 }
 0x157   :  { %vm221_vm15 = vcmp.gt.f32.partialorder %v1223_v0, 0.5 }
 0x159   :  { %v176_v19 = vpop.permute.xlu1 %175 }
 0x15a   :  { %v201_v22 = vmul.f32 %v1160_v6, %v176_v19 }
 0x15c   :  { %v1188_v29 = vsel %vm160_vm6, %v201_v22, 0.0 }
 0x15d   :  { %799 = vmatmul.msk.f32.gmra.mxu1 %vm247_vm0, %v84_v59  ;;  %vm217_vm7 = vcmp.gt.f32.partialorder %v1188_v29, 0.5  ;;  %v196_v58 = vpop.permute.xlu2 %195  ;;  %v1214_v59 = vsel %vm163_vm12, %v204_v54, 0.0 }
 0x15e   :  { %vm220_vm13 = vcmp.gt.f32.partialorder %v1214_v59, 0.5 }
 0x162   :  { %v135_v30 = vpop.permute.xlu1 %134 }
 0x163   :  { %vm161_vm8 = vcmp.eq.f32.partialorder %v135_v30, %v1165_v8 }
 0x164   :  { %v1196_v42 = vsel %vm161_vm8, %v202_v35, 0.0 }
 0x165   :  { %800 = vmatmul.msk.f32.gmra.mxu1 %vm247_vm0, %v85_v60  ;;  %vm218_vm9 = vcmp.gt.f32.partialorder %v1196_v42, 0.5 }
 0x16a   :  { %v140_v44 = vpop.permute.xlu1 %139 }
 0x16b   :  { %vm162_vm10 = vcmp.eq.f32.partialorder %v140_v44, %v1165_v8 }
 0x16c   :  { %v1204_v51 = vsel %vm162_vm10, %v203_v46, 0.0 }
 0x16d   :  { %801 = vmatmul.msk.f32.gmra.mxu1 %vm247_vm0, %v86_v62  ;;  %vm219_vm11 = vcmp.gt.f32.partialorder %v1204_v51, 0.5 }
 0x175   :  { %802 = vmatmul.msk.f32.gmra.mxu1 %vm247_vm0, %v87_v63 }
 0x17d   :  { %803 = vmatmul.msk.f32.gmra.mxu1 %vm247_vm0, %v88_v1  ;;  %v155_v1 = vpop.permute.xlu2 %154 }
 0x185   :  { %804 = vmatmul.msk.f32.gmra.mxu1 %vm247_vm0, %v89_v2  ;;  %v206_v2 = vmul.f32 %v1160_v6, %v196_v58 }
 0x18d   :  { %805 = vmatmul.msk.f32.gmra.mxu1 %vm247_vm0, %v90_v3 }
 0x1d2   :  { %v305_v14 = vpop.f32.mrf.mxu1 }
 0x1d3   :  { %v329_v15 = vsel %vm215_vm2, %v305_v14, -1e+30 }
 0x1d4   :  { %v1175_v16 = vsel %vm158_vm1, %v329_v15, -2e+30  ;;  %vm165_vm1 = vcmp.eq.f32.partialorder %v155_v1, %v1165_v8 }
 0x1d5   :  { %v346_v17 = vsel %vm345_vm4, %v1175_v16, -inf  ;;  %v1229_v9 = vsel %vm165_vm1, %v206_v2, 0.0 }
 0x1d6   :  { %347 = vmax.xlane.f32.xlu1 %v346_v17  ;;  %vm222_vm2 = vcmp.gt.f32.partialorder %v1229_v9, 0.5 }
 0x1da   :  { %v308_v21 = vpop.f32.mrf.mxu1 }
 0x1db   :  { %v330_v23 = vsel %vm216_vm5, %v308_v21, -1e+30 }
 0x1dc   :  { %v1184_v25 = vsel %vm159_vm3, %v330_v23, -2e+30 }
 0x1dd   :  { %v349_v26 = vsel %vm345_vm4, %v1184_v25, -inf }
 0x1de   :  { %350 = vmax.xlane.f32.xlu0 %v349_v26 }
 0x1e2   :  { %v311_v38 = vpop.f32.mrf.mxu1 }
 0x1e3   :  { %v331_v39 = vsel %vm217_vm7, %v311_v38, -1e+30 }
 0x1e4   :  { %v1194_v41 = vsel %vm160_vm6, %v331_v39, -2e+30 }
 0x1e5   :  { %v352_v43 = vsel %vm345_vm4, %v1194_v41, -inf }
 0x1e6   :  { %353 = vmax.xlane.f32.xlu2 %v352_v43 }
 0x1ea   :  { %v314_v45 = vpop.f32.mrf.mxu1 }
 0x1eb   :  { %v332_v47 = vsel %vm218_vm9, %v314_v45, -1e+30 }
 0x1ec   :  { %v340_v48 = vsel %vm161_vm8, %v332_v47, -2e+30 }
 0x1ed   :  { %v355_v50 = vsel %vm345_vm4, %v340_v48, -inf }
 0x1ee   :  { %356 = vmax.xlane.f32.xlu1 %v355_v50 }
 0x1f2   :  { %v317_v53 = vpop.f32.mrf.mxu1 }
 0x1f3   :  { %v333_v55 = vsel %vm219_vm11, %v317_v53, -1e+30 }
 0x1f4   :  { %v1210_v56 = vsel %vm162_vm10, %v333_v55, -2e+30 }
 0x1f5   :  { %v358_v57 = vsel %vm345_vm4, %v1210_v56, -inf }
 0x1f6   :  { %359 = vmax.xlane.f32.xlu1 %v358_v57 }
 0x1fa   :  { %v320_v60 = vpop.f32.mrf.mxu1 }
 0x1fb   :  { %v334_v62 = vsel %vm220_vm13, %v320_v60, -1e+30 }
 0x1fc   :  { %v1219_v63 = vsel %vm163_vm12, %v334_v62, -2e+30 }
 0x1fd   :  { %v361_v52 = vsel %vm345_vm4, %v1219_v63, -inf }
 0x1fe   :  { %362 = vmax.xlane.f32.xlu0 %v361_v52 }
 0x202   :  { %v323_v3 = vpop.f32.mrf.mxu1 }
 0x203   :  { %v335_v4 = vsel %vm221_vm15, %v323_v3, -1e+30 }
 0x204   :  { %v343_v5 = vsel %vm164_vm14, %v335_v4, -2e+30 }
 0x205   :  { %v364_v7 = vsel %vm345_vm4, %v343_v5, -inf }
 0x206   :  { %365 = vmax.xlane.f32.xlu1 %v364_v7  ;;  %v100_v7 = vld [vmem:[%s1456_s3 + $0x48] sm:$0xff] }
 0x20a   :  { %v326_v10 = vpop.f32.mrf.mxu1 }
 0x20b   :  { %v336_v12 = vsel %vm222_vm2, %v326_v10, -1e+30 }
 0x20c   :  { %v344_v13 = vsel %vm165_vm1, %v336_v12, -2e+30  ;;  %v555_v12 = vsub.f32 0.0, %v100_v7 }
 0x20d   :  { %v367_v14 = vsel %vm345_vm4, %v344_v13, -inf }
 0x20e   :  { %368 = vmax.xlane.f32.xlu1 %v367_v14 }
 0x227   :  { %859 = vrot.lane.b32.xlu1 %v858_v37, %s954_s16 }
 0x249   :  { %v348_v6 = vpop.xlane.xlu1 %347 }
 0x24a   :  { %v370_v8 = vsub.f32 %v1175_v16, %v348_v6 }
 0x24c   :  { %v378_v15 = vmul.f32 1.442695, %v370_v8 }
 0x24e   :  { %877 = vpow2.f32 %v378_v15 }
 0x251   :  { %v351_v17 = vpop.xlane.xlu0 %350 }
 0x252   :  { %v371_v19 = vsub.f32 %v1184_v25, %v351_v17  ;;  %v101_v17 = vld [vmem:[%s1456_s3 + $0x50] sm:$0xff] }
 0x254   :  { %v1239_v20 = vpop.eup %877  ;;  %v380_v21 = vmul.f32 1.442695, %v371_v19 }
 0x255   :  { %v394_v22 = vsel %vm345_vm4, %v1239_v20, 0.0 }
 0x256   :  { %879 = vpow2.f32 %v380_v21  ;;  %395 = vadd.xlane.f32.xlu0 %v394_v22  ;;  %v564_v21 = vmul.f32 1.442695, %v555_v12 }
 0x259   :  { %v354_v23 = vpop.xlane.xlu2 %353 }
 0x25a   :  { %v372_v34 = vsub.f32 %v1194_v41, %v354_v23 }
 0x25c   :  { %v1244_v36 = vpop.eup %879  ;;  %v382_v37 = vmul.f32 1.442695, %v372_v34  ;;  %v91_v34 = vld [vmem:[%s1456_s3] sm:$0xff] }
 0x25d   :  { %v397_v16 = vsel %vm345_vm4, %v1244_v36, 0.0 }
 0x25e   :  { %881 = vpow2.f32 %v382_v37  ;;  %398 = vadd.xlane.f32.xlu2 %v397_v16  ;;  %v556_v16 = vsub.f32 0.0, %v101_v17 }
 0x261   :  { %v357_v25 = vpop.xlane.xlu1 %356 }
 0x262   :  { %v373_v26 = vsub.f32 %v340_v48, %v357_v25 }
 0x264   :  { %v1248_v30 = vpop.eup %881  ;;  %v384_v35 = vmul.f32 1.442695, %v373_v26 }
 0x265   :  { %v400_v38 = vsel %vm345_vm4, %v1248_v30, 0.0 }
 0x266   :  { %883 = vpow2.f32 %v384_v35  ;;  %401 = vadd.xlane.f32.xlu2 %v400_v38  ;;  %v546_v35 = vmul.f32 0.33, %v91_v34 }
 0x269   :  { %v360_v41 = vpop.xlane.xlu1 %359 }
 0x26a   :  { %869 = vrot.lane.b32.xlu0 %v868_v28, %s954_s16  ;;  %v374_v46 = vsub.f32 %v1210_v56, %v360_v41 }
 0x26c   :  { %v1256_v39 = vpop.eup %883  ;;  %v386_v28 = vmul.f32 1.442695, %v374_v46 }
 0x26d   :  { %v403_v40 = vsel %vm345_vm4, %v1256_v39, 0.0 }
 0x26e   :  { %404 = vadd.xlane.f32.xlu1 %v403_v40 }
 0x271   :  { %v363_v53 = vpop.xlane.xlu0 %362 }
 0x272   :  { %v375_v32 = vsub.f32 %v1219_v63, %v363_v53  ;;  %v99_v63 = vld [vmem:[%s1456_s3 + $0x40] sm:$0xff] }
 0x273   :  { %v554_v52 = vsub.f32 0.0, %v99_v63 }
 0x274   :  { %v388_v54 = vmul.f32 1.442695, %v375_v32 }
 0x275   :  { %v562_v4 = vmul.f32 1.442695, %v554_v52 }
 0x279   :  { %v366_v43 = vpop.xlane.xlu1 %365 }
 0x27a   :  { %v376_v44 = vsub.f32 %v343_v5, %v366_v43 }
 0x27c   :  { %v390_v45 = vmul.f32 1.442695, %v376_v44  ;;  %v566_v44 = vmul.f32 1.442695, %v556_v16 }
 0x27e   :  { %885 = vpow2.f32 %v390_v45  ;;  %864 = vrot.lane.b32.xlu2 %v863_v33, %s954_s16 }
 0x27f   :  { %887 = vpow2.f32 %v386_v28 }
 0x281   :  { %v369_v47 = vpop.xlane.xlu1 %368 }
 0x282   :  { %v377_v48 = vsub.f32 %v344_v13, %v369_v47 }
 0x284   :  { %v1265_v24 = vpop.eup %885  ;;  %v392_v49 = vmul.f32 1.442695, %v377_v48 }
 0x285   :  { %v412_v27 = vsel %vm345_vm4, %v1265_v24, 0.0  ;;  %v1269_v50 = vpop.eup %887 }
 0x286   :  { %413 = vadd.xlane.f32.xlu1 %v412_v27  ;;  %889 = vpow2.f32 %v392_v49  ;;  %v406_v31 = vsel %vm345_vm4, %v1269_v50, 0.0 }
 0x287   :  { %891 = vpow2.f32 %v388_v54  ;;  %v102_v54 = vld [vmem:[%s1456_s3 + $0x58] sm:$0xff] }
 0x28c   :  { %v1274_v33 = vpop.eup %889 }
 0x28d   :  { %v415_v57 = vsel %vm345_vm4, %v1274_v33, 0.0  ;;  %v1278_v60 = vpop.eup %891 }
 0x28e   :  { %v409_v61 = vsel %vm345_vm4, %v1278_v60, 0.0 }
 0x294   :  { %407 = vadd.xlane.f32.xlu0 %v406_v31 }
 0x299   :  { %v860_v55 = vpop.permute.xlu1 %859 }
 0x29a   :  { %v861_v56 = vunpack.i.l.bf16 %v860_v55  ;;  %v862_v58 = vunpack.i.h.bf16 %v860_v55 }
 0x29c   :  { %416 = vadd.xlane.f32.xlu0 %v415_v57  ;;  %668 = vmatpush.msra.mxu2 %v861_v56 }
 0x29e   :  { %669 = vmatpush.msra.mxu2 %v862_v58 }
 0x2a7   :  { %410 = vadd.xlane.f32.xlu2 %v409_v61 }
 0x2c9   :  { %v396_v62 = vpop.xlane.xlu0 %395 }
 0x2ca   :  { %893 = vrcp.f32 %v396_v62  ;;  %v429_v6 = vand.u32 2147483648, %v396_v62  ;;  %vm423_vm5 = vweird.f32 %v396_v62  ;;  %v427_v19 = vand.u32 2147483647, %v396_v62 }
 0x2cc   :  { %v430_v25 = vor.u32 1.1754944e-38, %v429_v6  ;;  %vm428_vm7 = vcmp.eq.f32.partialorder %v427_v19, 8.507059e+37 }
 0x2d0   :  { %v894_v1 = vpop.eup %893 }
 0x2d1   :  { %v419_v2 = vmul.f32 %v894_v1, %v396_v62  ;;  %v399_v3 = vpop.xlane.xlu2 %398  ;;  %vm424_vm3 = vweird.f32 %v894_v1 }
 0x2d2   :  { %895 = vrcp.f32 %v399_v3  ;;  %vm425_vm6 = vmor %vm423_vm5, %vm424_vm3  ;;  %v444_v45 = vand.u32 2147483648, %v399_v3  ;;  %vm438_vm9 = vweird.f32 %v399_v3  ;;  %v442_v47 = vand.u32 2147483647, %v399_v3 }
 0x2d3   :  { %v420_v5 = vsub.f32 1.0, %v419_v2  ;;  %897 = vpow2.f32 %v562_v4 }
 0x2d4   :  { %v445_v58 = vor.u32 1.1754944e-38, %v444_v45  ;;  %vm443_vm11 = vcmp.eq.f32.partialorder %v442_v47, 8.507059e+37 }
 0x2d5   :  { %v421_v10 = vmul.f32 %v894_v1, %v420_v5 }
 0x2d7   :  { %v422_v14 = vadd.f32 %v894_v1, %v421_v10 }
 0x2d8   :  { %v896_v13 = vpop.eup %895 }
 0x2d9   :  { %v434_v8 = vmul.f32 %v896_v13, %v399_v3  ;;  %v1288_v15 = vpop.xlane.xlu2 %401  ;;  %v898_v23 = vpop.eup %897  ;;  %v426_v37 = vsel %vm425_vm6, %v894_v1, %v422_v14  ;;  %vm439_vm8 = vweird.f32 %v896_v13  ;;  %v557_v1 = vsub.f32 0.0, %v102_v54 }
 0x2da   :  { %899 = vrcp.f32 %v1288_v15  ;;  %v578_v38 = vmul.f32 0.33, %v898_v23  ;;  %v431_v40 = vsel %vm428_vm7, %v430_v25, %v426_v37  ;;  %vm1305_vm10 = vmor %vm438_vm9, %vm439_vm8  ;;  %v459_v12 = vand.u32 2147483648, %v1288_v15  ;;  %v93_v23 = vld [vmem:[%s1456_s3 + $0x10] sm:$0xff] }
 0x2db   :  { %v435_v22 = vsub.f32 1.0, %v434_v8  ;;  %901 = vpow2.f32 %v564_v21  ;;  %v432_v48 = vmul.f32 %v1239_v20, %v431_v40  ;;  %v92_v20 = vld [vmem:[%s1456_s3 + $0x8] sm:$0xff]  ;;  %vm453_vm13 = vweird.f32 %v1288_v15 }
 0x2dc   :  { %v586_v49 = vadd.f32 %v578_v38, %v546_v35  ;;  %v870_v55 = vpop.permute.xlu0 %869  ;;  %v547_v5 = vmul.f32 0.33, %v92_v20  ;;  %v568_v17 = vmul.f32 1.442695, %v557_v1  ;;  %v460_v37 = vor.u32 1.1754944e-38, %v459_v12  ;;  %v95_v1 = vld [vmem:[%s1456_s3 + $0x20] sm:$0xff] }
 0x2dd   :  { %v436_v26 = vmul.f32 %v896_v13, %v435_v22  ;;  %v538_v63 = vmul.f32 0.33, %v432_v48  ;;  %v871_v2 = vunpack.i.l.bf16 %v870_v55  ;;  %v872_v14 = vunpack.i.h.bf16 %v870_v55 }
 0x2de   :  { %v594_v52 = vmul.f32 %v586_v49, %v1170_v11  ;;  %v457_v11 = vand.u32 2147483647, %v1288_v15  ;;  %v548_v25 = vmul.f32 0.33, %v93_v23 }
 0x2df   :  { %v437_v43 = vadd.f32 %v896_v13, %v436_v26 }
 0x2e0   :  { %v1297_v41 = vpop.eup %899  ;;  %v602_v6 = vadd.f32 %v594_v52, %v538_v63  ;;  %vm458_vm15 = vcmp.eq.f32.partialorder %v457_v11, 8.507059e+37  ;;  %v104_v63 = vld [vmem:[%s1456_s3 + $0x68] sm:$0xff] }
 0x2e1   :  { %v449_v46 = vmul.f32 %v1297_v41, %v1288_v15  ;;  %v865_v27 = vpop.permute.xlu2 %864  ;;  %v1301_v28 = vpop.xlane.xlu1 %404  ;;  %v441_v56 = vsel %vm1305_vm10, %v896_v13, %v437_v43  ;;  %vm454_vm12 = vweird.f32 %v1297_v41 }
 0x2e2   :  { %903 = vrcp.f32 %v1301_v28  ;;  %v866_v32 = vunpack.i.l.bf16 %v865_v27  ;;  %v902_v57 = vpop.eup %901  ;;  %v867_v62 = vunpack.i.h.bf16 %v865_v27  ;;  %v446_v3 = vsel %vm443_vm11, %v445_v58, %v441_v56  ;;  %vm455_vm14 = vmor %vm453_vm13, %vm454_vm12 }
 0x2e3   :  { %v450_v31 = vsub.f32 1.0, %v449_v46  ;;  %905 = vpow2.f32 %v566_v44  ;;  %v579_v7 = vmul.f32 0.33, %v902_v57  ;;  %v447_v8 = vmul.f32 %v1244_v36, %v446_v3  ;;  %v103_v57 = vld [vmem:[%s1456_s3 + $0x60] sm:$0xff] }
 0x2e4   :  { %670 = vmatpush.msra.mxu2 %v866_v32  ;;  %907 = vpow2.f32 %v568_v17  ;;  %v474_v40 = vand.u32 2147483648, %v1301_v28  ;;  %vm468_vm2 = vweird.f32 %v1301_v28  ;;  %v472_v43 = vand.u32 2147483647, %v1301_v28 }
 0x2e5   :  { %v451_v61 = vmul.f32 %v1297_v41, %v450_v31  ;;  %v587_v22 = vadd.f32 %v579_v7, %v547_v5  ;;  %v539_v15 = vmul.f32 0.33, %v447_v8  ;;  %v558_v58 = vsub.f32 0.0, %v103_v57 }
 0x2e6   :  { %671 = vmatpush.msra.mxu2 %v867_v62  ;;  %v475_v47 = vor.u32 1.1754944e-38, %v474_v40  ;;  %vm473_vm5 = vcmp.eq.f32.partialorder %v472_v43, 8.507059e+37  ;;  %v559_v3 = vsub.f32 0.0, %v104_v63 }
 0x2e7   :  { %v452_v10 = vadd.f32 %v1297_v41, %v451_v61  ;;  %v595_v26 = vmul.f32 %v587_v22, %v1179_v18  ;;  %v94_v18 = vld [vmem:[%s1456_s3 + $0x18] sm:$0xff]  ;;  %v105_v22 = vld [vmem:[%s1456_s3 + $0x70] sm:$0xff] }
 0x2e8   :  { %v904_v4 = vpop.eup %903  ;;  %672 = vmatpush.msra.mxu2 %v871_v2  ;;  %v572_v11 = vmul.f32 1.442695, %v559_v3 }
 0x2e9   :  { %v464_v13 = vmul.f32 %v904_v4, %v1301_v28  ;;  %v906_v21 = vpop.eup %905  ;;  %v456_v34 = vsel %vm455_vm14, %v1297_v41, %v452_v10  ;;  %vm469_vm1 = vweird.f32 %v904_v4  ;;  %v603_v44 = vadd.f32 %v595_v26, %v539_v15 }
 0x2ea   :  { %673 = vmatpush.msra.mxu2 %v872_v14  ;;  %v461_v36 = vsel %vm458_vm15, %v460_v37, %v456_v34  ;;  %v580_v35 = vmul.f32 0.33, %v906_v21  ;;  %vm470_vm3 = vmor %vm468_vm2, %vm469_vm1  ;;  %v908_v27 = vpop.eup %907  ;;  %v549_v28 = vmul.f32 0.33, %v94_v18  ;;  %v550_v10 = vmul.f32 0.33, %v95_v1 }
 0x2eb   :  { %v465_v19 = vsub.f32 1.0, %v464_v13  ;;  %806 = vmatmul.msk.f32.vlgmr.msra.gmra.mxu2 %vm345_vm4, %v602_v6  ;;  %v462_v41 = vmul.f32 %v1248_v30, %v461_v36  ;;  %v581_v31 = vmul.f32 0.33, %v908_v27 }
 0x2ec   :  { %v588_v45 = vadd.f32 %v580_v35, %v548_v25 }
 0x2ed   :  { %v466_v16 = vmul.f32 %v904_v4, %v465_v19  ;;  %v540_v48 = vmul.f32 0.33, %v462_v41  ;;  %v589_v54 = vadd.f32 %v581_v31, %v549_v28 }
 0x2ee   :  { %v596_v53 = vmul.f32 %v588_v45, %v1188_v29  ;;  %v570_v29 = vmul.f32 1.442695, %v558_v58 }
 0x2ef   :  { %v467_v38 = vadd.f32 %v904_v4, %v466_v16  ;;  %v597_v56 = vmul.f32 %v589_v54, %v1196_v42  ;;  %v560_v16 = vsub.f32 0.0, %v105_v22 }
 0x2f0   :  { %v604_v32 = vadd.f32 %v596_v53, %v540_v48 }
 0x2f1   :  { %v471_v46 = vsel %vm470_vm3, %v904_v4, %v467_v38  ;;  %v574_v40 = vmul.f32 1.442695, %v560_v16 }
 0x2f2   :  { %v476_v49 = vsel %vm473_vm5, %v475_v47, %v471_v46 }
 0x2f3   :  { %807 = vmatmul.msk.f32.gmra.mxu2 %vm345_vm4, %v603_v44  ;;  %v477_v30 = vmul.f32 %v1256_v39, %v476_v49 }
 0x2f5   :  { %v541_v55 = vmul.f32 0.33, %v477_v30 }
 0x2f7   :  { %v605_v20 = vadd.f32 %v597_v56, %v541_v55 }
 0x2f9   :  { %v1348_v62 = vpop.xlane.xlu1 %413 }
 0x2fa   :  { %vm513_vm12 = vweird.f32 %v1348_v62  ;;  %v517_v54 = vand.u32 2147483647, %v1348_v62 }
 0x2fb   :  { %808 = vmatmul.msk.f32.gmra.mxu2 %vm345_vm4, %v604_v32  ;;  %v519_v32 = vand.u32 2147483648, %v1348_v62 }
 0x2fc   :  { %vm518_vm2 = vcmp.eq.f32.partialorder %v517_v54, 8.507059e+37 }
 0x303   :  { %809 = vmatmul.msk.f32.gmra.mxu2 %vm345_vm4, %v605_v20 }
 0x307   :  { %v408_v61 = vpop.xlane.xlu0 %407 }
 0x308   :  { %909 = vrcp.f32 %v408_v61  ;;  %v489_v4 = vand.u32 2147483648, %v408_v61  ;;  %v487_v7 = vand.u32 2147483647, %v408_v61  ;;  %vm483_vm7 = vweird.f32 %v408_v61 }
 0x309   :  { %911 = vpow2.f32 %v570_v29  ;;  %v97_v29 = vld [vmem:[%s1456_s3 + $0x30] sm:$0xff] }
 0x30a   :  { %913 = vrcp.f32 %v1348_v62  ;;  %v490_v6 = vor.u32 1.1754944e-38, %v489_v4  ;;  %vm488_vm9 = vcmp.eq.f32.partialorder %v487_v7, 8.507059e+37  ;;  %v552_v1 = vmul.f32 0.33, %v97_v29 }
 0x30e   :  { %v910_v39 = vpop.eup %909 }
 0x30f   :  { %v479_v42 = vmul.f32 %v910_v39, %v408_v61  ;;  %v912_v52 = vpop.eup %911  ;;  %vm484_vm6 = vweird.f32 %v910_v39  ;;  %v1359_v8 = vpop.xlane.xlu0 %416 }
 0x310   :  { %v582_v12 = vmul.f32 0.33, %v912_v52  ;;  %v1357_v14 = vpop.eup %913  ;;  %vm485_vm8 = vmor %vm483_vm7, %vm484_vm6  ;;  %915 = vrcp.f32 %v1359_v8  ;;  %vm528_vm5 = vweird.f32 %v1359_v8 }
 0x311   :  { %v480_v2 = vsub.f32 1.0, %v479_v42  ;;  %v509_v23 = vmul.f32 %v1357_v14, %v1348_v62  ;;  %917 = vpow2.f32 %v572_v11  ;;  %vm514_vm10 = vweird.f32 %v1357_v14 }
 0x312   :  { %v590_v19 = vadd.f32 %v582_v12, %v550_v10  ;;  %vm1385_vm13 = vmor %vm513_vm12, %vm514_vm10  ;;  %v520_v62 = vor.u32 1.1754944e-38, %v519_v32  ;;  %v534_v10 = vand.u32 2147483648, %v1359_v8  ;;  %v532_v12 = vand.u32 2147483647, %v1359_v8 }
 0x313   :  { %v481_v5 = vmul.f32 %v910_v39, %v480_v2  ;;  %v510_v36 = vsub.f32 1.0, %v509_v23 }
 0x314   :  { %v598_v15 = vmul.f32 %v590_v19, %v1204_v51  ;;  %v106_v51 = vld [vmem:[%s1456_s3 + $0x78] sm:$0xff]  ;;  %vm533_vm7 = vcmp.eq.f32.partialorder %v532_v12, 8.507059e+37 }
 0x315   :  { %v482_v13 = vadd.f32 %v910_v39, %v481_v5  ;;  %v511_v44 = vmul.f32 %v1357_v14, %v510_v36  ;;  %v561_v47 = vsub.f32 0.0, %v106_v51  ;;  %v735_v51 = vld [vmem:[%s1455_s2 + $0x20] sm:$0xff] }
 0x316   :  { %v1369_v35 = vpop.eup %915 }
 0x317   :  { %v486_v17 = vsel %vm485_vm8, %v910_v39, %v482_v13  ;;  %v918_v38 = vpop.eup %917  ;;  %v524_v41 = vmul.f32 %v1369_v35, %v1359_v8  ;;  %v512_v48 = vadd.f32 %v1357_v14, %v511_v44  ;;  %v576_v57 = vmul.f32 1.442695, %v561_v47  ;;  %v736_v44 = vld [vmem:[%s1455_s2 + $0x28] sm:$0xff] }
 0x318   :  { %v491_v21 = vsel %vm488_vm9, %v490_v6, %v486_v17  ;;  %v583_v27 = vmul.f32 0.33, %v918_v38  ;;  %vm529_vm3 = vweird.f32 %v1369_v35  ;;  %v98_v6 = vld [vmem:[%s1456_s3 + $0x38] sm:$0xff]  ;;  %v535_v17 = vor.u32 1.1754944e-38, %v534_v10 }
 0x319   :  { %v492_v34 = vmul.f32 %v1269_v50, %v491_v21  ;;  %v96_v50 = vld [vmem:[%s1456_s3 + $0x28] sm:$0xff]  ;;  %v525_v53 = vsub.f32 1.0, %v524_v41  ;;  %v516_v63 = vsel %vm1385_vm13, %v1357_v14, %v512_v48  ;;  %vm530_vm6 = vmor %vm528_vm5, %vm529_vm3  ;;  %v553_v22 = vmul.f32 0.33, %v98_v6  ;;  %s955_s3 = smov 16   ;;  %v734_v41 = vld [vmem:[%s1455_s2 + $0x18] sm:$0xff] }
 0x31a   :  { %v411_v37 = vpop.xlane.xlu2 %410  ;;  %v551_v46 = vmul.f32 0.33, %v96_v50  ;;  %v521_v3 = vsel %vm518_vm2, %v520_v62, %v516_v63  ;;  %v737_v50 = vld [vmem:[%s1455_s2 + $0x30] sm:$0xff]  ;;  %vm725_vm8 = vcmask 261120   ;;  %vm728_vm9 = vcmask 392192  }
 0x31b   :  { %919 = vrcp.f32 %v411_v37  ;;  %v542_v25 = vmul.f32 0.33, %v492_v34  ;;  %v504_v49 = vand.u32 2147483648, %v411_v37  ;;  %v502_v31 = vand.u32 2147483647, %v411_v37 }
 0x31c   :  { %921 = vpow2.f32 %v574_v40  ;;  %vm498_vm14 = vweird.f32 %v411_v37  ;;  %v591_v56 = vadd.f32 %v583_v27, %v551_v46  ;;  %v526_v61 = vmul.f32 %v1369_v35, %v525_v53  ;;  %v732_v46 = vld [vmem:[%s1455_s2 + $0x8] sm:$0xff]  ;;  %v731_v27 = vld [vmem:[%s1455_s2] sm:$0xff] }
 0x31d   :  { %v606_v26 = vadd.f32 %v598_v15, %v542_v25  ;;  %v505_v20 = vor.u32 1.1754944e-38, %v504_v49  ;;  %vm503_vm1 = vcmp.eq.f32.partialorder %v502_v31, 8.507059e+37  ;;  %923 = vpow2.f32 %v576_v57  ;;  %v876_v57 = vld [vmem:[%s1455_s2 + $0x40] ss:$0 sm:$0xff] }
 0x31e   :  { %v599_v4 = vmul.f32 %v591_v56, %v1214_v59  ;;  %v527_v5 = vadd.f32 %v1369_v35, %v526_v61 }
 0x31f   :  { %810 = vmatmul.msk.f32.gmra.mxu2 %vm345_vm4, %v606_v26 }
 0x320   :  { %v531_v59 = vsel %vm530_vm6, %v1369_v35, %v527_v5 }
 0x321   :  { %v920_v43 = vpop.eup %919  ;;  %v536_v21 = vsel %vm533_vm7, %v535_v17, %v531_v59 }
 0x322   :  { %v494_v45 = vmul.f32 %v920_v43, %v411_v37  ;;  %vm499_vm11 = vweird.f32 %v920_v43  ;;  %v922_v58 = vpop.eup %921  ;;  %v537_v34 = vmul.f32 %v1274_v33, %v536_v21 }
 0x323   :  { %vm500_vm15 = vmor %vm498_vm14, %vm499_vm11  ;;  %v584_v2 = vmul.f32 0.33, %v922_v58  ;;  %v924_v11 = vpop.eup %923 }
 0x324   :  { %v495_v18 = vsub.f32 1.0, %v494_v45  ;;  %v585_v23 = vmul.f32 0.33, %v924_v11  ;;  %v545_v16 = vmul.f32 0.33, %v537_v34  ;;  %v733_v45 = vld [vmem:[%s1455_s2 + $0x10] sm:$0xff] }
 0x325   :  { %v592_v14 = vadd.f32 %v584_v2, %v552_v1 }
 0x326   :  { %v496_v28 = vmul.f32 %v920_v43, %v495_v18  ;;  %v593_v37 = vadd.f32 %v585_v23, %v553_v22 }
 0x327   :  { %v600_v8 = vmul.f32 %v592_v14, %v1223_v0 }
 0x328   :  { %v497_v55 = vadd.f32 %v920_v43, %v496_v28  ;;  %v601_v15 = vmul.f32 %v593_v37, %v1229_v9  ;;  %v738_v9 = vld [vmem:[%s1455_s2 + $0x38] sm:$0xff] }
 0x329   :  { %755 = vmatpush.msrb.mxu3 %v738_v9 }
 0x32a   :  { %v501_v39 = vsel %vm500_vm15, %v920_v43, %v497_v55  ;;  %v609_v25 = vadd.f32 %v601_v15, %v545_v16 }
 0x32b   :  { %v506_v42 = vsel %vm503_vm1, %v505_v20, %v501_v39  ;;  %756 = vmatpush.msrb.mxu3 %v737_v50 }
 0x32c   :  { %v507_v52 = vmul.f32 %v1278_v60, %v506_v42  ;;  %v522_v60 = vmul.f32 %v1265_v24, %v521_v3 }
 0x32d   :  { %757 = vmatpush.msrb.mxu3 %v736_v44 }
 0x32e   :  { %v543_v7 = vmul.f32 0.33, %v507_v52  ;;  %v544_v19 = vmul.f32 0.33, %v522_v60 }
 0x32f   :  { %758 = vmatpush.msrb.mxu3 %v735_v51 }
 0x330   :  { %v607_v13 = vadd.f32 %v599_v4, %v543_v7  ;;  %v608_v24 = vadd.f32 %v600_v8, %v544_v19 }
 0x331   :  { %759 = vmatpush.msrb.mxu3 %v734_v41 }
 0x332   :  { %811 = vmatmul.msk.f32.gmra.mxu2 %vm345_vm4, %v607_v13 }
 0x333   :  { %760 = vmatpush.msrb.mxu3 %v733_v45 }
 0x335   :  { %761 = vmatpush.msrb.mxu3 %v732_v46 }
 0x337   :  { %762 = vmatpush.msrb.mxu3 %v731_v27 }
 0x33a   :  { %812 = vmatmul.msk.f32.gmra.mxu2 %vm345_vm4, %v608_v24 }
 0x342   :  { %813 = vmatmul.msk.f32.gmra.mxu2 %vm345_vm4, %v609_v25 }
 0x36e   :  { %v675_v36 = vpop.f32.mrf.mxu2 }
 0x376   :  { %v678_v26 = vpop.f32.mrf.mxu2 }
 0x37e   :  { %v681_v35 = vpop.f32.mrf.mxu2 }
 0x37f   :  { %701 = vrot.lane.b32.xlu1 %v681_v35, %s955_s3 }
 0x386   :  { %v684_v0 = vpop.f32.mrf.mxu2 }
 0x3a2   :  { %v687_v38 = vpop.f32.mrf.mxu2 }
 0x3a3   :  { %709 = vrot.lane.b32.xlu0 %v687_v38, %s956_s8 }
 0x3ab   :  { %703 = vrot.lane.b32.xlu0 %v684_v0, %s955_s3 }
 0x3b5   :  { %v690_v33 = vpop.f32.mrf.mxu2 }
 0x3b6   :  { %711 = vrot.lane.b32.xlu1 %v690_v33, %s956_s8 }
 0x3bd   :  { %v693_v40 = vpop.f32.mrf.mxu2 }
 0x3be   :  { %717 = vrot.lane.b32.xlu2 %v693_v40, %s957_s9 }
 0x3c5   :  { %v696_v43 = vpop.f32.mrf.mxu2 }
 0x3c6   :  { %719 = vrot.lane.b32.xlu2 %v696_v43, %s957_s9 }
 0x3f1   :  { %v702_v18 = vpop.permute.xlu1 %701 }
 0x3f2   :  { %v723_v48 = vsel %vm247_vm0, %v675_v36, %v702_v18 }
 0x415   :  { %v710_v47 = vpop.permute.xlu0 %709 }
 0x416   :  { %v726_v49 = vsel %vm725_vm8, %v723_v48, %v710_v47 }
 0x418   :  { %v718_v53 = vpop.permute.xlu2 %717 }
 0x419   :  { %v729_v28 = vsel %vm728_vm9, %v726_v49, %v718_v53 }
 0x41a   :  { %814 = vmatmul.msk.f32.vlgmr.msrb.gmra.mxu3 %vm345_vm4, %v729_v28 }
 0x41d   :  { %v704_v31 = vpop.permute.xlu0 %703 }
 0x41e   :  { %v724_v32 = vsel %vm247_vm0, %v678_v26, %v704_v31 }
 0x420   :  { %v720_v54 = vpop.permute.xlu2 %719 }
 0x428   :  { %v712_v30 = vpop.permute.xlu1 %711 }
 0x429   :  { %v727_v55 = vsel %vm725_vm8, %v724_v32, %v712_v30 }
 0x42a   :  { %v730_v56 = vsel %vm728_vm9, %v727_v55, %v720_v54 }
 0x42b   :  { %815 = vmatmul.msk.f32.gmra.mxu3 %vm345_vm4, %v730_v56 }
 0x49d   :  { %v764_v20 = vpop.f32.mrf.mxu3 }
 0x49e   :  { %v765_v58 = vadd.f32 %v876_v57, %v764_v20 }
 0x4a0   :  { %770 = vst.msk [vmem:[#allocation2] sm:$0xff] %vm725_vm8, %v765_v58 }
 0x4ae   :  { %v767_v29 = vpop.f32.mrf.mxu3 }
 0x4af   :  { %v768_v61 = vadd.f32 %v876_v57, %v767_v29 }
 0x4b1   :  { %771 = vst.msk [vmem:[#allocation2 + $0x8] sm:$0xff] %vm725_vm8, %v768_v61 }
 0x4b2   :  { %784 = dma.vmem_to_hbm [thread:$0]  %s777_s1, 256, %s779_s30, [#allocation3], %s959_s5, %s959_s5, %s960_s6  }
 0x4b3   :  { %949 = dma.done.wait [#allocation3], 256  }
 0x4b4   :  { %950 = vsyncadd [#allocation3], 4294967040 }
 0x4b5   :  { %789 = vsyncpa [#allocation3], 1 }

</bundles_post_ra>
